<compile_context>
chip_gen: v7x
topology: tpu7x:2x2x1
jax: 0.10.0
libtpu: 0.0.40
codegen_flags: <defaults>
</compile_context>

<pallas_src>
import functools

import jax
import jax.numpy as jnp
from jax import lax
from jax.experimental import pallas as pl
from jax.experimental.pallas import tpu as pltpu

BN_EPS = 1e-5
LANE = 128


def _round_up(n, m):
    return (n + m - 1) // m * m


# ------------------------------ fused kernel --------------------------------

def _conv3_bn_relu(h, w_ref, gamma, beta, L):
    """kernel_size=3 / padding=1 conv as 3 shifted matmuls + BN(train) + ReLU.

    h:      (rows, Ci) f32 value, rows ordered b*L + l, channels padded to 128
    w_ref:  (3, Ci, Co) VMEM ref, w_ref[k][ci, co] == torch_w[co, ci, k]
    gamma/beta: (1, Co) f32 (zero in the padded channel columns)
    returns (rows, Co) f32
    """
    rows, Ci = h.shape
    # position-within-sequence of every row; used to zero the taps that would
    # otherwise wrap across batch boundaries (these are the conv's pad zeros).
    l_idx = lax.broadcasted_iota(jnp.int32, (rows, Ci), 0) % L
    tap_m1 = jnp.where(l_idx == 0, 0.0,
                       pltpu.roll(h, shift=1, axis=0))            # x[l-1]
    tap_p1 = jnp.where(l_idx == L - 1, 0.0,
                       pltpu.roll(h, shift=rows - 1, axis=0))     # x[l+1]

    y = jnp.dot(tap_m1, w_ref[0], preferred_element_type=jnp.float32)
    y = y + jnp.dot(h, w_ref[1], preferred_element_type=jnp.float32)
    y = y + jnp.dot(tap_p1, w_ref[2], preferred_element_type=jnp.float32)
    # conv bias intentionally omitted: BN's mean subtraction cancels it exactly.

    # BatchNorm1d training-mode forward: biased stats over all B*L positions,
    # single-pass variance E[y^2] - mean^2, f32 throughout.  Fold gamma and
    # rsqrt(var+eps) into one scale, beta and mean into one shift, so the
    # (rows, Co)-wide work is a single mul + add + relu.
    mean = jnp.mean(y, axis=0, keepdims=True)
    var = jnp.mean(y * y, axis=0, keepdims=True) - mean * mean
    scale = gamma * lax.rsqrt(var + BN_EPS)        # (1, Co), tiny
    shift = beta - mean * scale                    # (1, Co), tiny
    return jnp.maximum(y * scale + shift, 0.0)


def _down_block_kernel(x_ref, w1_ref, g1_ref, b1_ref, w2_ref, g2_ref, b2_ref,
                       full_ref, down_ref, *, L):
    rows = x_ref.shape[0]
    h1 = _conv3_bn_relu(x_ref[...], w1_ref, g1_ref[...], b1_ref[...], L)
    h2 = _conv3_bn_relu(h1, w2_ref, g2_ref[...], b2_ref[...], L)
    full_ref[...] = h2
    # fused MaxPool1d(2): max over adjacent length positions (rows 2i, 2i+1),
    # read back strided from the VMEM-resident full output (lane-dense store).
    even = full_ref[pl.ds(0, rows // 2, 2), :]
    odd = full_ref[pl.ds(1, rows // 2, 2), :]
    down_ref[...] = jnp.maximum(even, odd)


# ------------------------------ host wrapper ---------------------------------

def down_block(x, p):
    """x: (B, Cin, L) f32 -> (x_full (B, Cout, L), x_down (B, Cout, L//2))."""
    B, Cin, L = x.shape
    Cout = p["w1"].shape[0]
    assert L % 2 == 0
    Cip = _round_up(Cin, LANE)
    Cop = _round_up(Cout, LANE)
    rows = B * L

    # NCL -> (B*L, C) rows-by-channels, channels on the lane axis, zero-padded.
    x2d = jnp.pad(jnp.transpose(x, (0, 2, 1)),
                  ((0, 0), (0, 0), (0, Cip - Cin))).reshape(rows, Cip)

    def prep_w(w, cip):
        co, ci, _ = w.shape
        wt = jnp.transpose(w, (2, 1, 0))                   # (3, Cin, Cout)
        return jnp.pad(wt, ((0, 0), (0, cip - ci), (0, Cop - co)))

    def prep_v(v):
        return jnp.pad(v, (0, Cop - v.shape[0])).reshape(1, Cop)

    w1 = prep_w(p["w1"], Cip)
    w2 = prep_w(p["w2"], Cop)
    g1, bt1 = prep_v(p["g1"]), prep_v(p["beta1"])
    g2, bt2 = prep_v(p["g2"]), prep_v(p["beta2"])
    # p["b1"], p["b2"] (conv biases) are not passed: BN cancels them exactly.

    kernel = functools.partial(_down_block_kernel, L=L)
    full2d, down2d = pl.pallas_call(
        kernel,
        out_shape=(jax.ShapeDtypeStruct((rows, Cop), jnp.float32),
                   jax.ShapeDtypeStruct((rows // 2, Cop), jnp.float32)),
        grid=(1,),
        in_specs=[
            pl.BlockSpec((rows, Cip), lambda i: (0, 0)),
            pl.BlockSpec((3, Cip, Cop), lambda i: (0, 0, 0)),
            pl.BlockSpec((1, Cop), lambda i: (0, 0)),
            pl.BlockSpec((1, Cop), lambda i: (0, 0)),
            pl.BlockSpec((3, Cop, Cop), lambda i: (0, 0, 0)),
            pl.BlockSpec((1, Cop), lambda i: (0, 0)),
            pl.BlockSpec((1, Cop), lambda i: (0, 0)),
        ],
        out_specs=(pl.BlockSpec((rows, Cop), lambda i: (0, 0)),
                   pl.BlockSpec((rows // 2, Cop), lambda i: (0, 0))),
        compiler_params=pltpu.CompilerParams(
            dimension_semantics=("arbitrary",),
            vmem_limit_bytes=32 * 1024 * 1024),
    )(x2d, w1, g1, bt1, w2, g2, bt2)

    # lane-dense kernel outputs -> PyTorch NCL layout (tiny XLA epilogue).
    x_full = jnp.transpose(full2d.reshape(B, L, Cop)[:, :, :Cout], (0, 2, 1))
    x_down = jnp.transpose(down2d.reshape(B, L // 2, Cop)[:, :, :Cout],
                           (0, 2, 1))
    return x_full, x_down


# ----------------------------- pure-JAX reference ----------------------------

def _ref_conv_block(x, w, b, g, beta):
    y = lax.conv_general_dilated(x, w, window_strides=(1,), padding=[(1, 1)],
                                 dimension_numbers=("NCH", "OIH", "NCH"))
    y = y + b[None, :, None]
    mean = jnp.mean(y, axis=(0, 2), keepdims=True)
    var = jnp.mean((y - mean) ** 2, axis=(0, 2), keepdims=True)
    y = (y - mean) * lax.rsqrt(var + BN_EPS)
    y = y * g[None, :, None] + beta[None, :, None]
    return jnp.maximum(y, 0.0)


def _ref_down_block(x, p):
    x = _ref_conv_block(x, p["w1"], p["b1"], p["g1"], p["beta1"])
    x = _ref_conv_block(x, p["w2"], p["b2"], p["g2"], p["beta2"])
    B, C, L = x.shape
    xd = jnp.max(x.reshape(B, C, L // 2, 2), axis=-1)
    return x, xd


# ---------------------------------- main --------------------------------------

if __name__ == "__main__":
    B, Cin, Cout, L = 2, 4, 8, 16

    key = jax.random.PRNGKey(0)
    ks = jax.random.split(key, 9)
    params = {
        "w1":    0.1 * jax.random.normal(ks[0], (Cout, Cin, 3), jnp.float32),
        "b1":    0.1 * jax.random.normal(ks[1], (Cout,), jnp.float32),
        "g1":    1.0 + 0.1 * jax.random.normal(ks[2], (Cout,), jnp.float32),
        "beta1": 0.1 * jax.random.normal(ks[3], (Cout,), jnp.float32),
        "w2":    0.1 * jax.random.normal(ks[4], (Cout, Cout, 3), jnp.float32),
        "b2":    0.1 * jax.random.normal(ks[5], (Cout,), jnp.float32),
        "g2":    1.0 + 0.1 * jax.random.normal(ks[6], (Cout,), jnp.float32),
        "beta2": 0.1 * jax.random.normal(ks[7], (Cout,), jnp.float32),
    }

    x = jax.random.normal(ks[8], (B, Cin, L), jnp.float32)

    x_full, x_down = jax.jit(down_block)(x, params)
    jax.block_until_ready((x_full, x_down))

    r_full, r_down = _ref_down_block(x, params)
    assert x_full.shape == (B, Cout, L) and x_down.shape == (B, Cout, L // 2)
    assert jnp.allclose(x_full, r_full, rtol=1e-4, atol=1e-4)
    assert jnp.allclose(x_down, r_down, rtol=1e-4, atol=1e-4)

    print("KERNEL_OK")
</pallas_src>

<mosaic_0001>
module attributes {stable_mosaic.version = 11 : i64} {
  func.func @_down_block_kernel(%arg0: i32, %arg1: memref<32x128xf32, #tpu.memory_space<vmem>>, %arg2: memref<3x128x128xf32, #tpu.memory_space<vmem>>, %arg3: memref<1x128xf32, #tpu.memory_space<vmem>>, %arg4: memref<1x128xf32, #tpu.memory_space<vmem>>, %arg5: memref<3x128x128xf32, #tpu.memory_space<vmem>>, %arg6: memref<1x128xf32, #tpu.memory_space<vmem>>, %arg7: memref<1x128xf32, #tpu.memory_space<vmem>>, %arg8: memref<32x128xf32, #tpu.memory_space<vmem>>, %arg9: memref<16x128xf32, #tpu.memory_space<vmem>>) attributes {dimension_semantics = [#tpu.dimension_semantics<arbitrary>], iteration_bounds = array<i64: 1>, scalar_prefetch = 0 : i64, scratch_operands = 0 : i64, tpu.core_type = #tpu.core_type<tc>, window_params = [{pipeline_mode = #tpu.pipeline_mode<synchronous>, transform_indices = @transform_0, window_bounds = array<i64: 32, 128>}, {pipeline_mode = #tpu.pipeline_mode<synchronous>, transform_indices = @transform_1, window_bounds = array<i64: 3, 128, 128>}, {pipeline_mode = #tpu.pipeline_mode<synchronous>, transform_indices = @transform_2, window_bounds = array<i64: 1, 128>}, {pipeline_mode = #tpu.pipeline_mode<synchronous>, transform_indices = @transform_3, window_bounds = array<i64: 1, 128>}, {pipeline_mode = #tpu.pipeline_mode<synchronous>, transform_indices = @transform_4, window_bounds = array<i64: 3, 128, 128>}, {pipeline_mode = #tpu.pipeline_mode<synchronous>, transform_indices = @transform_5, window_bounds = array<i64: 1, 128>}, {pipeline_mode = #tpu.pipeline_mode<synchronous>, transform_indices = @transform_6, window_bounds = array<i64: 1, 128>}, {pipeline_mode = #tpu.pipeline_mode<synchronous>, transform_indices = @transform_7, window_bounds = array<i64: 32, 128>}, {pipeline_mode = #tpu.pipeline_mode<synchronous>, transform_indices = @transform_8, window_bounds = array<i64: 16, 128>}]} {
    %c0 = arith.constant 0 : index
    %c0_0 = arith.constant 0 : index
    %0 = vector.load %arg1[%c0, %c0_0] : memref<32x128xf32, #tpu.memory_space<vmem>>, vector<32x128xf32>
    %c0_1 = arith.constant 0 : index
    %c0_2 = arith.constant 0 : index
    %1 = vector.load %arg3[%c0_1, %c0_2] : memref<1x128xf32, #tpu.memory_space<vmem>>, vector<1x128xf32>
    %c0_3 = arith.constant 0 : index
    %c0_4 = arith.constant 0 : index
    %2 = vector.load %arg4[%c0_3, %c0_4] : memref<1x128xf32, #tpu.memory_space<vmem>>, vector<1x128xf32>
    %3 = tpu.iota {dimensions = array<i32: 0>} : vector<32x128xi32>
    %c16_i32 = arith.constant 16 : i32
    %c0_i32 = arith.constant 0 : i32
    %4 = arith.cmpi eq, %c16_i32, %c0_i32 : i32
    %c1_i32 = arith.constant 1 : i32
    %5 = arith.select %4, %c1_i32, %c16_i32 : i32
    %6 = vector.broadcast %5 : i32 to vector<32x128xi32>
    %7 = arith.remsi %3, %6 : vector<32x128xi32>
    %c0_i32_5 = arith.constant 0 : i32
    %8 = vector.broadcast %c0_i32_5 : i32 to vector<32x128xi32>
    %9 = arith.cmpi ne, %7, %8 : vector<32x128xi32>
    %c0_i32_6 = arith.constant 0 : i32
    %10 = vector.broadcast %c0_i32_6 : i32 to vector<32x128xi32>
    %11 = arith.cmpi slt, %7, %10 : vector<32x128xi32>
    %c0_i32_7 = arith.constant 0 : i32
    %12 = arith.cmpi slt, %5, %c0_i32_7 : i32
    %13 = vector.broadcast %12 : i1 to vector<32x128xi1>
    %14 = vector.broadcast %13 : vector<32x128xi1> to vector<32x128xi1>
    %15 = arith.xori %11, %14 : vector<32x128xi1>
    %16 = arith.andi %15, %9 : vector<32x128xi1>
    %17 = vector.broadcast %5 : i32 to vector<32x128xi32>
    %18 = arith.addi %7, %17 : vector<32x128xi32>
    %19 = arith.select %16, %18, %7 : vector<32x128xi1>, vector<32x128xi32>
    %c0_i32_8 = arith.constant 0 : i32
    %20 = vector.broadcast %c0_i32_8 : i32 to vector<32x128xi32>
    %21 = arith.cmpi eq, %19, %20 : vector<32x128xi32>
    %c1_i32_9 = arith.constant 1 : i32
    %22 = tpu.dynamic_rotate %0 by %c1_i32_9 dim 0 : vector<32x128xf32>, i32 -> vector<32x128xf32>
    %cst = arith.constant 0.000000e+00 : f32
    %23 = vector.broadcast %cst : f32 to vector<32x128xf32>
    %24 = arith.select %21, %23, %22 : vector<32x128xi1>, vector<32x128xf32>
    %c15_i32 = arith.constant 15 : i32
    %25 = vector.broadcast %c15_i32 : i32 to vector<32x128xi32>
    %26 = arith.cmpi eq, %19, %25 : vector<32x128xi32>
    %c31_i32 = arith.constant 31 : i32
    %27 = tpu.dynamic_rotate %0 by %c31_i32 dim 0 : vector<32x128xf32>, i32 -> vector<32x128xf32>
    %cst_10 = arith.constant 0.000000e+00 : f32
    %28 = vector.broadcast %cst_10 : f32 to vector<32x128xf32>
    %29 = arith.select %26, %28, %27 : vector<32x128xi1>, vector<32x128xf32>
    %c0_11 = arith.constant 0 : index
    %c0_12 = arith.constant 0 : index
    %c0_13 = arith.constant 0 : index
    %30 = vector.load %arg2[%c0_11, %c0_12, %c0_13] : memref<3x128x128xf32, #tpu.memory_space<vmem>>, vector<1x128x128xf32>
    %31 = vector.shape_cast %30 : vector<1x128x128xf32> to vector<128x128xf32>
    %cst_14 = arith.constant dense<0.000000e+00> : vector<32x128xf32>
    %32 = tpu.matmul %24, %31, %cst_14 {dimension_numbers = #tpu.dot_dimension_numbers<[1], [0], [0], [1], [0, 0, 1, 1], [], []>} : vector<32x128xf32>, vector<128x128xf32>, vector<32x128xf32> -> vector<32x128xf32>
    %c1 = arith.constant 1 : index
    %c0_15 = arith.constant 0 : index
    %c0_16 = arith.constant 0 : index
    %33 = vector.load %arg2[%c1, %c0_15, %c0_16] : memref<3x128x128xf32, #tpu.memory_space<vmem>>, vector<1x128x128xf32>
    %34 = vector.shape_cast %33 : vector<1x128x128xf32> to vector<128x128xf32>
    %cst_17 = arith.constant dense<0.000000e+00> : vector<32x128xf32>
    %35 = tpu.matmul %0, %34, %cst_17 {dimension_numbers = #tpu.dot_dimension_numbers<[1], [0], [0], [1], [0, 0, 1, 1], [], []>} : vector<32x128xf32>, vector<128x128xf32>, vector<32x128xf32> -> vector<32x128xf32>
    %36 = arith.addf %32, %35 : vector<32x128xf32>
    %c2 = arith.constant 2 : index
    %c0_18 = arith.constant 0 : index
    %c0_19 = arith.constant 0 : index
    %37 = vector.load %arg2[%c2, %c0_18, %c0_19] : memref<3x128x128xf32, #tpu.memory_space<vmem>>, vector<1x128x128xf32>
    %38 = vector.shape_cast %37 : vector<1x128x128xf32> to vector<128x128xf32>
    %cst_20 = arith.constant dense<0.000000e+00> : vector<32x128xf32>
    %39 = tpu.matmul %29, %38, %cst_20 {dimension_numbers = #tpu.dot_dimension_numbers<[1], [0], [0], [1], [0, 0, 1, 1], [], []>} : vector<32x128xf32>, vector<128x128xf32>, vector<32x128xf32> -> vector<32x128xf32>
    %40 = arith.addf %36, %39 : vector<32x128xf32>
    %cst_21 = arith.constant dense<0.000000e+00> : vector<128xf32>
    %41 = vector.multi_reduction <add>, %40, %cst_21 [0] : vector<32x128xf32> to vector<128xf32>
    %42 = vector.shape_cast %41 : vector<128xf32> to vector<1x128xf32>
    %cst_22 = arith.constant 3.200000e+01 : f32
    %43 = vector.broadcast %cst_22 : f32 to vector<1x128xf32>
    %44 = arith.divf %42, %43 : vector<1x128xf32>
    %45 = arith.mulf %40, %40 : vector<32x128xf32>
    %cst_23 = arith.constant dense<0.000000e+00> : vector<128xf32>
    %46 = vector.multi_reduction <add>, %45, %cst_23 [0] : vector<32x128xf32> to vector<128xf32>
    %47 = vector.shape_cast %46 : vector<128xf32> to vector<1x128xf32>
    %cst_24 = arith.constant 3.200000e+01 : f32
    %48 = vector.broadcast %cst_24 : f32 to vector<1x128xf32>
    %49 = arith.divf %47, %48 : vector<1x128xf32>
    %50 = arith.mulf %44, %44 : vector<1x128xf32>
    %51 = arith.subf %49, %50 : vector<1x128xf32>
    %cst_25 = arith.constant 9.99999974E-6 : f32
    %52 = vector.broadcast %cst_25 : f32 to vector<1x128xf32>
    %53 = arith.addf %51, %52 : vector<1x128xf32>
    %54 = math.rsqrt %53 : vector<1x128xf32>
    %55 = arith.mulf %1, %54 : vector<1x128xf32>
    %56 = arith.mulf %44, %55 : vector<1x128xf32>
    %57 = arith.subf %2, %56 : vector<1x128xf32>
    %58 = vector.broadcast %55 : vector<1x128xf32> to vector<32x128xf32>
    %59 = arith.mulf %40, %58 : vector<32x128xf32>
    %60 = vector.broadcast %57 : vector<1x128xf32> to vector<32x128xf32>
    %61 = arith.addf %59, %60 : vector<32x128xf32>
    %cst_26 = arith.constant 0.000000e+00 : f32
    %62 = vector.broadcast %cst_26 : f32 to vector<32x128xf32>
    %63 = arith.maximumf %61, %62 : vector<32x128xf32>
    %c0_27 = arith.constant 0 : index
    %c0_28 = arith.constant 0 : index
    %64 = vector.load %arg6[%c0_27, %c0_28] : memref<1x128xf32, #tpu.memory_space<vmem>>, vector<1x128xf32>
    %c0_29 = arith.constant 0 : index
    %c0_30 = arith.constant 0 : index
    %65 = vector.load %arg7[%c0_29, %c0_30] : memref<1x128xf32, #tpu.memory_space<vmem>>, vector<1x128xf32>
    %66 = tpu.iota {dimensions = array<i32: 0>} : vector<32x128xi32>
    %c16_i32_31 = arith.constant 16 : i32
    %c0_i32_32 = arith.constant 0 : i32
    %67 = arith.cmpi eq, %c16_i32_31, %c0_i32_32 : i32
    %c1_i32_33 = arith.constant 1 : i32
    %68 = arith.select %67, %c1_i32_33, %c16_i32_31 : i32
    %69 = vector.broadcast %68 : i32 to vector<32x128xi32>
    %70 = arith.remsi %66, %69 : vector<32x128xi32>
    %c0_i32_34 = arith.constant 0 : i32
    %71 = vector.broadcast %c0_i32_34 : i32 to vector<32x128xi32>
    %72 = arith.cmpi ne, %70, %71 : vector<32x128xi32>
    %c0_i32_35 = arith.constant 0 : i32
    %73 = vector.broadcast %c0_i32_35 : i32 to vector<32x128xi32>
    %74 = arith.cmpi slt, %70, %73 : vector<32x128xi32>
    %c0_i32_36 = arith.constant 0 : i32
    %75 = arith.cmpi slt, %68, %c0_i32_36 : i32
    %76 = vector.broadcast %75 : i1 to vector<32x128xi1>
    %77 = vector.broadcast %76 : vector<32x128xi1> to vector<32x128xi1>
    %78 = arith.xori %74, %77 : vector<32x128xi1>
    %79 = arith.andi %78, %72 : vector<32x128xi1>
    %80 = vector.broadcast %68 : i32 to vector<32x128xi32>
    %81 = arith.addi %70, %80 : vector<32x128xi32>
    %82 = arith.select %79, %81, %70 : vector<32x128xi1>, vector<32x128xi32>
    %c0_i32_37 = arith.constant 0 : i32
    %83 = vector.broadcast %c0_i32_37 : i32 to vector<32x128xi32>
    %84 = arith.cmpi eq, %82, %83 : vector<32x128xi32>
    %c1_i32_38 = arith.constant 1 : i32
    %85 = tpu.dynamic_rotate %63 by %c1_i32_38 dim 0 : vector<32x128xf32>, i32 -> vector<32x128xf32>
    %cst_39 = arith.constant 0.000000e+00 : f32
    %86 = vector.broadcast %cst_39 : f32 to vector<32x128xf32>
    %87 = arith.select %84, %86, %85 : vector<32x128xi1>, vector<32x128xf32>
    %c15_i32_40 = arith.constant 15 : i32
    %88 = vector.broadcast %c15_i32_40 : i32 to vector<32x128xi32>
    %89 = arith.cmpi eq, %82, %88 : vector<32x128xi32>
    %c31_i32_41 = arith.constant 31 : i32
    %90 = tpu.dynamic_rotate %63 by %c31_i32_41 dim 0 : vector<32x128xf32>, i32 -> vector<32x128xf32>
    %cst_42 = arith.constant 0.000000e+00 : f32
    %91 = vector.broadcast %cst_42 : f32 to vector<32x128xf32>
    %92 = arith.select %89, %91, %90 : vector<32x128xi1>, vector<32x128xf32>
    %c0_43 = arith.constant 0 : index
    %c0_44 = arith.constant 0 : index
    %c0_45 = arith.constant 0 : index
    %93 = vector.load %arg5[%c0_43, %c0_44, %c0_45] : memref<3x128x128xf32, #tpu.memory_space<vmem>>, vector<1x128x128xf32>
    %94 = vector.shape_cast %93 : vector<1x128x128xf32> to vector<128x128xf32>
    %cst_46 = arith.constant dense<0.000000e+00> : vector<32x128xf32>
    %95 = tpu.matmul %87, %94, %cst_46 {dimension_numbers = #tpu.dot_dimension_numbers<[1], [0], [0], [1], [0, 0, 1, 1], [], []>} : vector<32x128xf32>, vector<128x128xf32>, vector<32x128xf32> -> vector<32x128xf32>
    %c1_47 = arith.constant 1 : index
    %c0_48 = arith.constant 0 : index
    %c0_49 = arith.constant 0 : index
    %96 = vector.load %arg5[%c1_47, %c0_48, %c0_49] : memref<3x128x128xf32, #tpu.memory_space<vmem>>, vector<1x128x128xf32>
    %97 = vector.shape_cast %96 : vector<1x128x128xf32> to vector<128x128xf32>
    %cst_50 = arith.constant dense<0.000000e+00> : vector<32x128xf32>
    %98 = tpu.matmul %63, %97, %cst_50 {dimension_numbers = #tpu.dot_dimension_numbers<[1], [0], [0], [1], [0, 0, 1, 1], [], []>} : vector<32x128xf32>, vector<128x128xf32>, vector<32x128xf32> -> vector<32x128xf32>
    %99 = arith.addf %95, %98 : vector<32x128xf32>
    %c2_51 = arith.constant 2 : index
    %c0_52 = arith.constant 0 : index
    %c0_53 = arith.constant 0 : index
    %100 = vector.load %arg5[%c2_51, %c0_52, %c0_53] : memref<3x128x128xf32, #tpu.memory_space<vmem>>, vector<1x128x128xf32>
    %101 = vector.shape_cast %100 : vector<1x128x128xf32> to vector<128x128xf32>
    %cst_54 = arith.constant dense<0.000000e+00> : vector<32x128xf32>
    %102 = tpu.matmul %92, %101, %cst_54 {dimension_numbers = #tpu.dot_dimension_numbers<[1], [0], [0], [1], [0, 0, 1, 1], [], []>} : vector<32x128xf32>, vector<128x128xf32>, vector<32x128xf32> -> vector<32x128xf32>
    %103 = arith.addf %99, %102 : vector<32x128xf32>
    %cst_55 = arith.constant dense<0.000000e+00> : vector<128xf32>
    %104 = vector.multi_reduction <add>, %103, %cst_55 [0] : vector<32x128xf32> to vector<128xf32>
    %105 = vector.shape_cast %104 : vector<128xf32> to vector<1x128xf32>
    %cst_56 = arith.constant 3.200000e+01 : f32
    %106 = vector.broadcast %cst_56 : f32 to vector<1x128xf32>
    %107 = arith.divf %105, %106 : vector<1x128xf32>
    %108 = arith.mulf %103, %103 : vector<32x128xf32>
    %cst_57 = arith.constant dense<0.000000e+00> : vector<128xf32>
    %109 = vector.multi_reduction <add>, %108, %cst_57 [0] : vector<32x128xf32> to vector<128xf32>
    %110 = vector.shape_cast %109 : vector<128xf32> to vector<1x128xf32>
    %cst_58 = arith.constant 3.200000e+01 : f32
    %111 = vector.broadcast %cst_58 : f32 to vector<1x128xf32>
    %112 = arith.divf %110, %111 : vector<1x128xf32>
    %113 = arith.mulf %107, %107 : vector<1x128xf32>
    %114 = arith.subf %112, %113 : vector<1x128xf32>
    %cst_59 = arith.constant 9.99999974E-6 : f32
    %115 = vector.broadcast %cst_59 : f32 to vector<1x128xf32>
    %116 = arith.addf %114, %115 : vector<1x128xf32>
    %117 = math.rsqrt %116 : vector<1x128xf32>
    %118 = arith.mulf %64, %117 : vector<1x128xf32>
    %119 = arith.mulf %107, %118 : vector<1x128xf32>
    %120 = arith.subf %65, %119 : vector<1x128xf32>
    %121 = vector.broadcast %118 : vector<1x128xf32> to vector<32x128xf32>
    %122 = arith.mulf %103, %121 : vector<32x128xf32>
    %123 = vector.broadcast %120 : vector<1x128xf32> to vector<32x128xf32>
    %124 = arith.addf %122, %123 : vector<32x128xf32>
    %cst_60 = arith.constant 0.000000e+00 : f32
    %125 = vector.broadcast %cst_60 : f32 to vector<32x128xf32>
    %126 = arith.maximumf %124, %125 : vector<32x128xf32>
    %c0_61 = arith.constant 0 : index
    %c0_62 = arith.constant 0 : index
    %127 = vector.load %arg8[%c0_61, %c0_62] : memref<32x128xf32, #tpu.memory_space<vmem>>, vector<32x128xf32>
    tpu.vector_store %arg8[%c0_61, %c0_62], %126 {strides = array<i32>} : memref<32x128xf32, #tpu.memory_space<vmem>>, vector<32x128xf32>,
    %c0_63 = arith.constant 0 : index
    %c0_64 = arith.constant 0 : index
    %128 = tpu.strided_load %arg8[%c0_63, %c0_64] {strides = array<i32: 2, 1>} : memref<32x128xf32, #tpu.memory_space<vmem>>, vector<16x128xf32>
    %c1_65 = arith.constant 1 : index
    %c0_66 = arith.constant 0 : index
    %129 = tpu.strided_load %arg8[%c1_65, %c0_66] {strides = array<i32: 2, 1>} : memref<32x128xf32, #tpu.memory_space<vmem>>, vector<16x128xf32>
    %130 = arith.maximumf %128, %129 : vector<16x128xf32>
    %c0_67 = arith.constant 0 : index
    %c0_68 = arith.constant 0 : index
    %131 = vector.load %arg9[%c0_67, %c0_68] : memref<16x128xf32, #tpu.memory_space<vmem>>, vector<16x128xf32>
    tpu.vector_store %arg9[%c0_67, %c0_68], %130 {strides = array<i32>} : memref<16x128xf32, #tpu.memory_space<vmem>>, vector<16x128xf32>,
    return
  }
  func.func @transform_0(%arg0: i32) -> (i32, i32) {
    %c0_i32 = arith.constant 0 : i32
    %c0_i32_0 = arith.constant 0 : i32
    %c0_i32_1 = arith.constant 0 : i32
    return %c0_i32, %c0_i32_0 : i32, i32
  }
  func.func @transform_1(%arg0: i32) -> (i32, i32, i32) {
    %c0_i32 = arith.constant 0 : i32
    %c0_i32_0 = arith.constant 0 : i32
    %c0_i32_1 = arith.constant 0 : i32
    %c0_i32_2 = arith.constant 0 : i32
    return %c0_i32, %c0_i32_0, %c0_i32_1 : i32, i32, i32
  }
  func.func @transform_2(%arg0: i32) -> (i32, i32) {
    %c0_i32 = arith.constant 0 : i32
    %c0_i32_0 = arith.constant 0 : i32
    %c0_i32_1 = arith.constant 0 : i32
    return %c0_i32, %c0_i32_0 : i32, i32
  }
  func.func @transform_3(%arg0: i32) -> (i32, i32) {
    %c0_i32 = arith.constant 0 : i32
    %c0_i32_0 = arith.constant 0 : i32
    %c0_i32_1 = arith.constant 0 : i32
    return %c0_i32, %c0_i32_0 : i32, i32
  }
  func.func @transform_4(%arg0: i32) -> (i32, i32, i32) {
    %c0_i32 = arith.constant 0 : i32
    %c0_i32_0 = arith.constant 0 : i32
    %c0_i32_1 = arith.constant 0 : i32
    %c0_i32_2 = arith.constant 0 : i32
    return %c0_i32, %c0_i32_0, %c0_i32_1 : i32, i32, i32
  }
  func.func @transform_5(%arg0: i32) -> (i32, i32) {
    %c0_i32 = arith.constant 0 : i32
    %c0_i32_0 = arith.constant 0 : i32
    %c0_i32_1 = arith.constant 0 : i32
    return %c0_i32, %c0_i32_0 : i32, i32
  }
  func.func @transform_6(%arg0: i32) -> (i32, i32) {
    %c0_i32 = arith.constant 0 : i32
    %c0_i32_0 = arith.constant 0 : i32
    %c0_i32_1 = arith.constant 0 : i32
    return %c0_i32, %c0_i32_0 : i32, i32
  }
  func.func @transform_7(%arg0: i32) -> (i32, i32) {
    %c0_i32 = arith.constant 0 : i32
    %c0_i32_0 = arith.constant 0 : i32
    %c0_i32_1 = arith.constant 0 : i32
    return %c0_i32, %c0_i32_0 : i32, i32
  }
  func.func @transform_8(%arg0: i32) -> (i32, i32) {
    %c0_i32 = arith.constant 0 : i32
    %c0_i32_0 = arith.constant 0 : i32
    %c0_i32_1 = arith.constant 0 : i32
    return %c0_i32, %c0_i32_0 : i32, i32
  }
}

</mosaic_0001>

<bundles_post_ra>
// kernel: down_block.1
= control target key start
LH: loop header
LB: loop body
LE: loop exit
PB: predicated region body
PF: predicated region fallthrough
CT: control target
= control target key end

     0   :  { %v34_v25 = vlaneseq  ;;  %s2049_s1 = inlined_call_operand.vmem [shape: f32[3,128,128], index: 1, kind: input, shape index: {}]   ;;  %s2050_s0 = inlined_call_operand.vmem [shape: f32[32,128], index: 0, kind: input, shape index: {}]   ;;  %s2051_s4 = inlined_call_operand.vmem [shape: f32[3,128,128], index: 4, kind: input, shape index: {}]   ;;  %s2052_s2 = inlined_call_operand.vmem [shape: f32[1,128], index: 2, kind: input, shape index: {}]   ;;  %s2053_s3 = inlined_call_operand.vmem [shape: f32[1,128], index: 3, kind: input, shape index: {}]   ;;  %s2054_s5 = inlined_call_operand.vmem [shape: f32[1,128], index: 5, kind: input, shape index: {}]   ;;  %s2055_s6 = inlined_call_operand.vmem [shape: f32[1,128], index: 6, kind: input, shape index: {}]   ;;  %s2056_s7 = inlined_call_operand.vmem [shape: f32[32,128], index: 7, kind: output, shape index: {0}]   ;;  %s2057_s8 = inlined_call_operand.vmem [shape: f32[16,128], index: 8, kind: output, shape index: {1}]  }
   0x1   :  { %v899_v0 = vld [vmem:[%s2049_s1 + $0x80] sm:$0xff]  ;;  %v900_v1 = vld [vmem:[%s2049_s1 + $0x88] sm:$0xff]  ;;  %v901_v2 = vld [vmem:[%s2049_s1 + $0x90] sm:$0xff] }
   0x2   :  { %v1334_v3 = vpack.c.bf16 %v900_v1, %v899_v0  ;;  %v902_v4 = vld [vmem:[%s2049_s1 + $0x98] sm:$0xff]  ;;  %v903_v6 = vld [vmem:[%s2049_s1 + $0xa0] sm:$0xff]  ;;  %v904_v7 = vld [vmem:[%s2049_s1 + $0xa8] sm:$0xff]  ;;  %v1651_v29 = vshrl.u32 %v34_v25, 7 }
   0x3   :  { %v1338_v5 = vpack.c.bf16 %v902_v4, %v901_v2  ;;  %v1342_v8 = vpack.c.bf16 %v904_v7, %v903_v6  ;;  %v1612_v9 = vld [vmem:[%s2050_s0] sm:$0xff]  ;;  %v905_v10 = vld [vmem:[%s2049_s1 + $0xb0] sm:$0xff]  ;;  %v906_v11 = vld [vmem:[%s2049_s1 + $0xb8] sm:$0xff] }
   0x4   :  { %1335 = vmatprep.subr.bf16.mxu0 %v1334_v3  ;;  %1138 = vmatprep.mubr.f32.mxu0 %v1612_v9  ;;  %v1346_v12 = vpack.c.bf16 %v906_v11, %v905_v10  ;;  %v907_v13 = vld [vmem:[%s2049_s1 + $0xc0] sm:$0xff]  ;;  %v908_v14 = vld [vmem:[%s2049_s1 + $0xc8] sm:$0xff]  ;;  %v909_v16 = vld [vmem:[%s2049_s1 + $0xd0] sm:$0xff]  ;;  %v91_v34 = vrot.slane %v1612_v9, 7  ;;  %v43_v38 = vand.u32 15, %v1651_v29  ;;  %vm95_vm0 = vcmp.lt.s32.totalorder %v1651_v29, 1 }
   0x5   :  { %1337 = vmatpush3.bf16.msra.mxu0 %v1334_v3  ;;  %v1350_v15 = vpack.c.bf16 %v908_v14, %v907_v13  ;;  %v910_v17 = vld [vmem:[%s2049_s1 + $0xd8] sm:$0xff]  ;;  %v911_v19 = vld [vmem:[%s2049_s1 + $0xe0] sm:$0xff]  ;;  %v912_v20 = vld [vmem:[%s2049_s1 + $0xe8] sm:$0xff]  ;;  %v37_v59 = vadd.s32 16, %v1651_v29  ;;  %v108_v4 = vrot.slane %v1612_v9, 1  ;;  %vm112_vm3 = vcmp.lt.s32.totalorder %v1651_v29, 7 }
   0x6   :  { %1339 = vmatprep.subr.bf16.mxu0 %v1338_v5  ;;  %v1354_v18 = vpack.c.bf16 %v910_v17, %v909_v16  ;;  %v1358_v21 = vpack.c.bf16 %v912_v20, %v911_v19  ;;  %v913_v22 = vld [vmem:[%s2049_s1 + $0xf0] sm:$0xff]  ;;  %v914_v23 = vld [vmem:[%s2049_s1 + $0xf8] sm:$0xff]  ;;  %v121_v26 = vld [vmem:[%s2049_s1] sm:$0xff]  ;;  %vm1690_vm1 = vcmp.ne.s32.totalorder %v43_v38, 0 }
   0x7   :  { %v1362_v24 = vpack.c.bf16 %v914_v23, %v913_v22  ;;  %v122_v27 = vld [vmem:[%s2049_s1 + $0x8] sm:$0xff]  ;;  %v123_v30 = vld [vmem:[%s2049_s1 + $0x10] sm:$0xff]  ;;  %v124_v31 = vld [vmem:[%s2049_s1 + $0x18] sm:$0xff]  ;;  %v57_v1 = vand.u32 15, %v37_v59 }
   0x8   :  { %v1366_v28 = vpack.c.bf16 %v122_v27, %v121_v26  ;;  %v1662_v32 = vld [vmem:[%s2050_s0 + $0x18] sm:$0xff]  ;;  %v1667_v33 = vld [vmem:[%s2050_s0 + $0x8] sm:$0xff]  ;;  %v1370_v35 = vpack.c.bf16 %v124_v31, %v123_v30  ;;  %v1673_v36 = vld [vmem:[%s2050_s0 + $0x10] sm:$0xff]  ;;  %v36_v30 = vadd.s32 8, %v1651_v29 }
   0x9   :  { %1341 = vmatpush3.bf16.msra.mxu0 %v1338_v5  ;;  %v94_v37 = vrot.slane %v1662_v32, 7  ;;  %v125_v39 = vld [vmem:[%s2049_s1 + $0x20] sm:$0xff]  ;;  %v126_v40 = vld [vmem:[%s2049_s1 + $0x28] sm:$0xff]  ;;  %v127_v44 = vld [vmem:[%s2049_s1 + $0x30] sm:$0xff]  ;;  %v92_v62 = vrot.slane %v1667_v33, 7  ;;  %v93_v63 = vrot.slane %v1673_v36, 7 }
   0xa   :  { %1343 = vmatprep.subr.bf16.mxu0 %v1342_v8  ;;  %v1374_v41 = vpack.c.bf16 %v126_v40, %v125_v39  ;;  %v128_v45 = vld [vmem:[%s2049_s1 + $0x38] sm:$0xff]  ;;  %v129_v47 = vld [vmem:[%s2049_s1 + $0x40] sm:$0xff]  ;;  %v130_v48 = vld [vmem:[%s2049_s1 + $0x48] sm:$0xff]  ;;  %v109_v6 = vrot.slane %v1667_v33, 1  ;;  %vm1748_vm2 = vcmp.ne.s32.totalorder %v57_v1, 0 }
   0xb   :  { %v99_v42 = vsel %vm95_vm0, %v94_v37, %v91_v34  ;;  %v1378_v46 = vpack.c.bf16 %v128_v45, %v127_v44  ;;  %v1382_v49 = vpack.c.bf16 %v130_v48, %v129_v47  ;;  %v131_v50 = vld [vmem:[%s2049_s1 + $0x50] sm:$0xff]  ;;  %v132_v51 = vld [vmem:[%s2049_s1 + $0x58] sm:$0xff]  ;;  %v133_v53 = vld [vmem:[%s2049_s1 + $0x60] sm:$0xff]  ;;  %v98_v5 = vsel %vm95_vm0, %v91_v34, %v92_v62 }
   0xc   :  { %v1386_v52 = vpack.c.bf16 %v132_v51, %v131_v50  ;;  %v134_v54 = vld [vmem:[%s2049_s1 + $0x68] sm:$0xff]  ;;  %v135_v56 = vld [vmem:[%s2049_s1 + $0x70] sm:$0xff]  ;;  %v136_v57 = vld [vmem:[%s2049_s1 + $0x78] sm:$0xff]  ;;  %v115_v14 = vsel %vm112_vm3, %v108_v4, %v109_v6  ;;  %v50_v34 = vand.u32 15, %v36_v30 }
   0xd   :  { %1345 = vmatpush3.bf16.msra.mxu0 %v1342_v8  ;;  %v1390_v55 = vpack.c.bf16 %v134_v54, %v133_v53  ;;  %v1394_v58 = vpack.c.bf16 %v136_v57, %v135_v56  ;;  %v919_v60 = vld [vmem:[%s2049_s1 + $0x100] sm:$0xff]  ;;  %v920_v61 = vld [vmem:[%s2049_s1 + $0x108] sm:$0xff]  ;;  %v921_v2 = vld [vmem:[%s2049_s1 + $0x110] sm:$0xff]  ;;  %v97_v8 = vsel %vm95_vm0, %v92_v62, %v93_v63 }
   0xe   :  { %1347 = vmatprep.subr.bf16.mxu0 %v1346_v12  ;;  %v1398_v0 = vpack.c.bf16 %v920_v61, %v919_v60  ;;  %v922_v3 = vld [vmem:[%s2049_s1 + $0x118] sm:$0xff]  ;;  %v923_v11 = vld [vmem:[%s2049_s1 + $0x120] sm:$0xff]  ;;  %v924_v9 = vld [vmem:[%s2049_s1 + $0x128] sm:$0xff]  ;;  %vm1803_vm4 = vcmp.ne.s32.totalorder %v50_v34, 15 }
   0xf   :  { %v1402_v7 = vpack.c.bf16 %v922_v3, %v921_v2  ;;  %v1406_v13 = vpack.c.bf16 %v924_v9, %v923_v11  ;;  %v926_v16 = vld [vmem:[%s2049_s1 + $0x138] sm:$0xff]  ;;  %v928_v19 = vld [vmem:[%s2049_s1 + $0x148] sm:$0xff]  ;;  %v933_v27 = vld [vmem:[%s2049_s1 + $0x170] sm:$0xff] }
  0x10   :  { %v930_v22 = vld [vmem:[%s2049_s1 + $0x158] sm:$0xff]  ;;  %v932_v25 = vld [vmem:[%s2049_s1 + $0x168] sm:$0xff]  ;;  %v951_v61 = vld [vmem:[%s2051_s4 + $0xe0] sm:$0xff] }
  0x11   :  { %1349 = vmatpush3.bf16.msra.mxu0 %v1346_v12  ;;  %v96_v12 = vsel %vm95_vm0, %v93_v63, %v94_v37  ;;  %v111_v37 = vrot.slane %v1662_v32, 1  ;;  %v940_v44 = vld [vmem:[%s2051_s4 + $0x88] sm:$0xff]  ;;  %v942_v47 = vld [vmem:[%s2051_s4 + $0x98] sm:$0xff]  ;;  %v512_v3 = vld [vmem:[%s2051_s4] sm:$0xff] }
  0x12   :  { %1351 = vmatprep.subr.bf16.mxu0 %v1350_v15  ;;  %v944_v50 = vld [vmem:[%s2051_s4 + $0xa8] sm:$0xff]  ;;  %v946_v53 = vld [vmem:[%s2051_s4 + $0xb8] sm:$0xff]  ;;  %v967_v10 = vld [vmem:[%s2051_s4 + $0x140] sm:$0xff] }
  0x13   :  { %v948_v56 = vld [vmem:[%s2051_s4 + $0xc8] sm:$0xff]  ;;  %v950_v59 = vld [vmem:[%s2051_s4 + $0xd8] sm:$0xff] }
  0x14   :  { %v952_v62 = vld [vmem:[%s2051_s4 + $0xe8] sm:$0xff]  ;;  %v954_v1 = vld [vmem:[%s2051_s4 + $0xf8] sm:$0xff] }
  0x15   :  { %1353 = vmatpush3.bf16.msra.mxu0 %v1350_v15  ;;  %v925_v15 = vld [vmem:[%s2049_s1 + $0x130] sm:$0xff]  ;;  %v1454_v63 = vpack.c.bf16 %v952_v62, %v951_v61  ;;  %v523_v43 = vld [vmem:[%s2051_s4 + $0x58] sm:$0xff] }
  0x16   :  { %1355 = vmatprep.subr.bf16.mxu0 %v1354_v18  ;;  %v1410_v17 = vpack.c.bf16 %v926_v16, %v925_v15 }
  0x19   :  { %1357 = vmatpush3.bf16.msra.mxu0 %v1354_v18  ;;  %v927_v18 = vld [vmem:[%s2049_s1 + $0x140] sm:$0xff] }
  0x1a   :  { %1359 = vmatprep.subr.bf16.mxu0 %v1358_v21  ;;  %v1414_v20 = vpack.c.bf16 %v928_v19, %v927_v18 }
  0x1d   :  { %1361 = vmatpush3.bf16.msra.mxu0 %v1358_v21  ;;  %v929_v21 = vld [vmem:[%s2049_s1 + $0x150] sm:$0xff] }
  0x1e   :  { %1363 = vmatprep.subr.bf16.mxu0 %v1362_v24  ;;  %v1418_v23 = vpack.c.bf16 %v930_v22, %v929_v21 }
  0x21   :  { %1365 = vmatpush3.bf16.msra.mxu0 %v1362_v24  ;;  %v931_v24 = vld [vmem:[%s2049_s1 + $0x160] sm:$0xff] }
  0x22   :  { %1367 = vmatprep.subr.bf16.mxu0 %v1366_v28  ;;  %v1422_v26 = vpack.c.bf16 %v932_v25, %v931_v24 }
  0x24   :  { %1139 = vmatmul.mubr.f32.vlgmr.msra.gmra.mrb[0].mxu0 %v1667_v33  ;;  %v110_v33 = vrot.slane %v1673_v36, 1 }
  0x25   :  { %1369 = vmatpush3.bf16.msra.mxu0 %v1366_v28  ;;  %1141 = vmatprep.mubr.f32.mxu0 %v1673_v36  ;;  %v934_v28 = vld [vmem:[%s2049_s1 + $0x178] sm:$0xff] }
  0x26   :  { %1371 = vmatprep.subr.bf16.mxu0 %v1370_v35  ;;  %v1426_v31 = vpack.c.bf16 %v934_v28, %v933_v27  ;;  %v114_v38 = vsel %vm112_vm3, %v109_v6, %v110_v33 }
  0x28   :  { %1142 = vmatmul.mubr.f32.gmra.mrb[2].mxu0 %v1662_v32  ;;  %v116_v32 = vsel %vm112_vm3, %v111_v37, %v108_v4  ;;  %v513_v4 = vld [vmem:[%s2051_s4 + $0x8] sm:$0xff] }
  0x29   :  { %1373 = vmatpush3.bf16.msra.mxu0 %v1370_v35  ;;  %1176 = vmatprep.mubr.msk.f32.mxu0 %vm1690_vm1, %v99_v42  ;;  %v38_v35 = vadd.s32 24, %v1651_v29  ;;  %v939_v42 = vld [vmem:[%s2051_s4 + $0x80] sm:$0xff] }
  0x2a   :  { %1375 = vmatprep.subr.bf16.mxu0 %v1374_v41  ;;  %v1430_v45 = vpack.c.bf16 %v940_v44, %v939_v42  ;;  %v1880_v42 = vsub.s32 0, %v1651_v29 }
  0x2b   :  { %v64_v40 = vand.u32 15, %v38_v35 }
  0x2c   :  { %1431 = vmatprep.subr.bf16.mxu1 %v1430_v45 }
  0x2d   :  { %1377 = vmatpush3.bf16.msra.mxu0 %v1374_v41  ;;  %v113_v41 = vsel %vm112_vm3, %v110_v33, %v111_v37  ;;  %vm1813_vm5 = vcmp.ne.s32.totalorder %v64_v40, 15  ;;  %1433 = vmatpush3.bf16.msra.mxu1 %v1430_v45 }
  0x2e   :  { %1379 = vmatprep.subr.bf16.mxu0 %v1378_v46 }
  0x31   :  { %1381 = vmatpush3.bf16.msra.mxu0 %v1378_v46  ;;  %v941_v46 = vld [vmem:[%s2051_s4 + $0x90] sm:$0xff] }
  0x32   :  { %1383 = vmatprep.subr.bf16.mxu0 %v1382_v49  ;;  %v1434_v48 = vpack.c.bf16 %v942_v47, %v941_v46  ;;  %v33_v46 = vld [vmem:[%s2053_s3] sm:$0x1] }
  0x34   :  { %1435 = vmatprep.subr.bf16.mxu1 %v1434_v48 }
  0x35   :  { %1385 = vmatpush3.bf16.msra.mxu0 %v1382_v49  ;;  %1437 = vmatpush3.bf16.msra.mxu1 %v1434_v48  ;;  %v943_v49 = vld [vmem:[%s2051_s4 + $0xa0] sm:$0xff] }
  0x36   :  { %1387 = vmatprep.subr.bf16.mxu0 %v1386_v52  ;;  %v1438_v51 = vpack.c.bf16 %v944_v50, %v943_v49 }
  0x38   :  { %1439 = vmatprep.subr.bf16.mxu1 %v1438_v51 }
  0x39   :  { %1389 = vmatpush3.bf16.msra.mxu0 %v1386_v52  ;;  %1441 = vmatpush3.bf16.msra.mxu1 %v1438_v51  ;;  %v945_v52 = vld [vmem:[%s2051_s4 + $0xb0] sm:$0xff] }
  0x3a   :  { %1391 = vmatprep.subr.bf16.mxu0 %v1390_v55  ;;  %v1442_v54 = vpack.c.bf16 %v946_v53, %v945_v52 }
  0x3c   :  { %1443 = vmatprep.subr.bf16.mxu1 %v1442_v54 }
  0x3d   :  { %1393 = vmatpush3.bf16.msra.mxu0 %v1390_v55  ;;  %1445 = vmatpush3.bf16.msra.mxu1 %v1442_v54  ;;  %v947_v55 = vld [vmem:[%s2051_s4 + $0xc0] sm:$0xff] }
  0x3e   :  { %1395 = vmatprep.subr.bf16.mxu0 %v1394_v58  ;;  %v1446_v57 = vpack.c.bf16 %v948_v56, %v947_v55 }
  0x40   :  { %1447 = vmatprep.subr.bf16.mxu1 %v1446_v57 }
  0x41   :  { %1397 = vmatpush3.bf16.msra.mxu0 %v1394_v58  ;;  %1449 = vmatpush3.bf16.msra.mxu1 %v1446_v57  ;;  %v949_v58 = vld [vmem:[%s2051_s4 + $0xd0] sm:$0xff] }
  0x42   :  { %1399 = vmatprep.subr.bf16.mxu0 %v1398_v0  ;;  %v1450_v60 = vpack.c.bf16 %v950_v59, %v949_v58  ;;  %v514_v58 = vld [vmem:[%s2051_s4 + $0x10] sm:$0xff]  ;;  %v515_v59 = vld [vmem:[%s2051_s4 + $0x18] sm:$0xff] }
  0x44   :  { %1177 = vmatmul.mubr.f32.vlgmr.msra.gmra.mrb[0].mxu0 %v98_v5  ;;  %1451 = vmatprep.subr.bf16.mxu1 %v1450_v60  ;;  %v1873_v5 = vpack.c.bf16 %v513_v4, %v512_v3  ;;  %v517_v3 = vld [vmem:[%s2051_s4 + $0x28] sm:$0xff] }
  0x45   :  { %1401 = vmatpush3.bf16.msra.mxu0 %v1398_v0  ;;  %1179 = vmatprep.mubr.msk.f32.mxu0 %vm1748_vm2, %v97_v8  ;;  %v953_v0 = vld [vmem:[%s2051_s4 + $0xf0] sm:$0xff] }
  0x46   :  { %1403 = vmatprep.subr.bf16.mxu0 %v1402_v7  ;;  %1453 = vmatpush3.bf16.msra.mxu1 %v1450_v60  ;;  %v1458_v2 = vpack.c.bf16 %v954_v1, %v953_v0  ;;  %v1466_v1 = vpack.c.bf16 %v515_v59, %v514_v58  ;;  %v972_v58 = vld [vmem:[%s2051_s4 + $0x168] sm:$0xff] }
  0x47   :  { %1455 = vmatprep.subr.bf16.mxu1 %v1454_v63 }
  0x48   :  { %1180 = vmatmul.mubr.f32.gmra.mrb[2].mxu0 %v96_v12 }
  0x49   :  { %1405 = vmatpush3.bf16.msra.mxu0 %v1402_v7  ;;  %1214 = vmatprep.mubr.f32.mxu0 %v115_v14 }
  0x4a   :  { %1407 = vmatprep.subr.bf16.mxu0 %v1406_v13  ;;  %1457 = vmatpush3.bf16.msra.mxu1 %v1454_v63 }
  0x4b   :  { %1459 = vmatprep.subr.bf16.mxu1 %v1458_v2 }
  0x4d   :  { %1409 = vmatpush3.bf16.msra.mxu0 %v1406_v13 }
  0x4e   :  { %1411 = vmatprep.subr.bf16.mxu0 %v1410_v17  ;;  %1461 = vmatpush3.bf16.msra.mxu1 %v1458_v2  ;;  %v516_v2 = vld [vmem:[%s2051_s4 + $0x20] sm:$0xff] }
  0x4f   :  { %1463 = vmatprep.subr.bf16.mxu1 %v1873_v5 }
  0x51   :  { %1413 = vmatpush3.bf16.msra.mxu0 %v1410_v17 }
  0x52   :  { %1415 = vmatprep.subr.bf16.mxu0 %v1414_v20 }
  0x55   :  { %1417 = vmatpush3.bf16.msra.mxu0 %v1414_v20 }
  0x56   :  { %1419 = vmatprep.subr.bf16.mxu0 %v1418_v23 }
  0x59   :  { %1421 = vmatpush3.bf16.msra.mxu0 %v1418_v23 }
  0x5a   :  { %1423 = vmatprep.subr.bf16.mxu0 %v1422_v26 }
  0x5d   :  { %1425 = vmatpush3.bf16.msra.mxu0 %v1422_v26 }
  0x5e   :  { %1427 = vmatprep.subr.bf16.mxu0 %v1426_v31 }
  0x61   :  { %1429 = vmatpush3.bf16.msra.mxu0 %v1426_v31 }
  0x64   :  { %1215 = vmatmul.mubr.msk.f32.vlgmr.msra.gmra.mrb[0].mxu0 %vm1803_vm4, %v114_v38 }
  0x65   :  { %1217 = vmatprep.mubr.f32.mxu0 %v113_v41 }
  0x68   :  { %1218 = vmatmul.mubr.msk.f32.gmra.mrb[2].mxu0 %vm1813_vm5, %v116_v32  ;;  %v32_v32 = vld [vmem:[%s2052_s2] sm:$0x1] }
 0x137   :  { %v1216_v6 = vpop.f32.mrb[0].mxu0 }
 0x138   :  { %v442_v7 = vmul.f32 %v1216_v6, %v1216_v6  ;;  %v407_v8 = vpop.f32.mrb[1].mxu0 }
 0x139   :  { %v430_v11 = vadd.f32 %v1216_v6, %v407_v8  ;;  %v441_v9 = vmul.f32 %v407_v8, %v407_v8 }
 0x13b   :  { %v445_v12 = vadd.f32 %v442_v7, %v441_v9  ;;  %v1219_v13 = vpop.f32.mrb[2].mxu0 }
 0x13c   :  { %v417_v14 = vpop.f32.mrb[3].mxu0  ;;  %v444_v17 = vmul.f32 %v1219_v13, %v1219_v13 }
 0x13d   :  { %v431_v15 = vadd.f32 %v430_v11, %v417_v14  ;;  %v443_v16 = vmul.f32 %v417_v14, %v417_v14 }
 0x13f   :  { %v432_v18 = vadd.f32 %v1219_v13, %v431_v15  ;;  %v446_v19 = vadd.f32 %v445_v12, %v443_v16  ;;  %v1470_v15 = vpack.c.bf16 %v517_v3, %v516_v2 }
 0x141   :  { %v433_v20 = vrot.slane %v432_v18, 4  ;;  %v447_v21 = vadd.f32 %v446_v19, %v444_v17 }
 0x143   :  { %v434_v22 = vadd.f32 %v433_v20, %v432_v18  ;;  %v448_v23 = vrot.slane %v447_v21, 4  ;;  %v518_v20 = vld [vmem:[%s2051_s4 + $0x30] sm:$0xff] }
 0x145   :  { %v435_v24 = vrot.slane %v434_v22, 2  ;;  %v449_v25 = vadd.f32 %v448_v23, %v447_v21  ;;  %v519_v21 = vld [vmem:[%s2051_s4 + $0x38] sm:$0xff] }
 0x147   :  { %v436_v26 = vadd.f32 %v435_v24, %v434_v22  ;;  %v450_v27 = vrot.slane %v449_v25, 2  ;;  %v1474_v24 = vpack.c.bf16 %v519_v21, %v518_v20 }
 0x149   :  { %v437_v28 = vrot.slane %v436_v26, 1  ;;  %v451_v30 = vadd.f32 %v450_v27, %v449_v25  ;;  %v520_v25 = vld [vmem:[%s2051_s4 + $0x40] sm:$0xff]  ;;  %v522_v27 = vld [vmem:[%s2051_s4 + $0x50] sm:$0xff] }
 0x14b   :  { %v438_v31 = vadd.f32 %v437_v28, %v436_v26  ;;  %v452_v33 = vrot.slane %v451_v30, 1  ;;  %v521_v26 = vld [vmem:[%s2051_s4 + $0x48] sm:$0xff]  ;;  %v1482_v28 = vpack.c.bf16 %v523_v43, %v522_v27  ;;  %v486_v43 = vld [vmem:[%s2054_s5] sm:$0x1] }
 0x14c   :  { %v1478_v29 = vpack.c.bf16 %v521_v26, %v520_v25 }
 0x14d   :  { %v440_v34 = vmul.f32 0.03125, %v438_v31  ;;  %v453_v35 = vadd.f32 %v452_v33, %v451_v30  ;;  %v524_v30 = vld [vmem:[%s2051_s4 + $0x60] sm:$0xff]  ;;  %v525_v31 = vld [vmem:[%s2051_s4 + $0x68] sm:$0xff] }
 0x14e   :  { %v1486_v33 = vpack.c.bf16 %v525_v31, %v524_v30  ;;  %v487_v31 = vld [vmem:[%s2055_s6] sm:$0x1] }
 0x14f   :  { %v454_v37 = vmul.f32 0.03125, %v453_v35  ;;  %v455_v38 = vmul.f32 %v440_v34, %v440_v34  ;;  %v527_v35 = vld [vmem:[%s2051_s4 + $0x78] sm:$0xff] }
 0x151   :  { %v456_v40 = vsub.f32 %v454_v37, %v455_v38  ;;  %v959_v38 = vld [vmem:[%s2051_s4 + $0x100] sm:$0xff] }
 0x153   :  { %v457_v41 = vadd.f32 1e-05, %v456_v40  ;;  %v960_v40 = vld [vmem:[%s2051_s4 + $0x108] sm:$0xff] }
 0x155   :  { %1542 = vrsqrt.f32 %v457_v41  ;;  %v1494_v41 = vpack.c.bf16 %v960_v40, %v959_v38 }
 0x15f   :  { %v1543_v44 = vpop.eup %1542 }
 0x160   :  { %v459_v45 = vmul.f32 %v1543_v44, %v32_v32  ;;  %v961_v32 = vld [vmem:[%s2051_s4 + $0x110] sm:$0xff]  ;;  %v962_v44 = vld [vmem:[%s2051_s4 + $0x118] sm:$0xff] }
 0x162   :  { %v460_v47 = vmul.f32 %v459_v45, %v440_v34  ;;  %v466_v48 = vrot.slane %v459_v45, %v1880_v42  ;;  %v526_v34 = vld [vmem:[%s2051_s4 + $0x70] sm:$0xff]  ;;  %v1498_v45 = vpack.c.bf16 %v962_v44, %v961_v32 }
 0x163   :  { %v1490_v37 = vpack.c.bf16 %v527_v35, %v526_v34 }
 0x164   :  { %v461_v49 = vsub.f32 %v33_v46, %v460_v47  ;;  %v470_v50 = vmul.f32 %v466_v48, %v417_v14  ;;  %v468_v51 = vmul.f32 %v466_v48, %v407_v8  ;;  %v469_v52 = vmul.f32 %v1216_v6, %v466_v48  ;;  %v963_v46 = vld [vmem:[%s2051_s4 + $0x120] sm:$0xff]  ;;  %v964_v47 = vld [vmem:[%s2051_s4 + $0x128] sm:$0xff] }
 0x165   :  { %v471_v53 = vmul.f32 %v1219_v13, %v466_v48  ;;  %v1502_v48 = vpack.c.bf16 %v964_v47, %v963_v46 }
 0x166   :  { %v476_v54 = vrot.slane %v461_v49, %v1880_v42  ;;  %v965_v49 = vld [vmem:[%s2051_s4 + $0x130] sm:$0xff] }
 0x168   :  { %v480_v55 = vadd.f32 %v476_v54, %v470_v50  ;;  %v478_v56 = vadd.f32 %v476_v54, %v468_v51  ;;  %v479_v57 = vadd.f32 %v476_v54, %v469_v52  ;;  %v481_v60 = vadd.f32 %v476_v54, %v471_v53  ;;  %v966_v50 = vld [vmem:[%s2051_s4 + $0x138] sm:$0xff]  ;;  %v968_v52 = vld [vmem:[%s2051_s4 + $0x148] sm:$0xff]  ;;  %v969_v54 = vld [vmem:[%s2051_s4 + $0x150] sm:$0xff] }
 0x169   :  { %v1506_v51 = vpack.c.bf16 %v966_v50, %v965_v49  ;;  %v1510_v53 = vpack.c.bf16 %v968_v52, %v967_v10 }
 0x16a   :  { %v482_v61 = vmax.f32 %v478_v56, 0.0  ;;  %v483_v62 = vmax.f32 %v479_v57, 0.0  ;;  %v484_v63 = vmax.f32 %v480_v55, 0.0  ;;  %v485_v0 = vmax.f32 %v481_v60, 0.0  ;;  %v970_v55 = vld [vmem:[%s2051_s4 + $0x158] sm:$0xff]  ;;  %v971_v57 = vld [vmem:[%s2051_s4 + $0x160] sm:$0xff] }
 0x16b   :  { %v1514_v56 = vpack.c.bf16 %v970_v55, %v969_v54  ;;  %v1518_v59 = vpack.c.bf16 %v972_v58, %v971_v57  ;;  %v973_v60 = vld [vmem:[%s2051_s4 + $0x170] sm:$0xff] }
 0x16c   :  { %1252 = vmatprep.mubr.f32.mxu1 %v482_v61  ;;  %v489_v4 = vrot.slane %v483_v62, 7  ;;  %v502_v6 = vrot.slane %v484_v63, 1  ;;  %v488_v7 = vrot.slane %v482_v61, 7  ;;  %v491_v8 = vrot.slane %v485_v0, 7 }
 0x16d   :  { %1253 = vmatmul.mubr.f32.vlgmr.msra.gmra.mrb[0].mxu1 %v483_v62  ;;  %v490_v11 = vrot.slane %v484_v63, 7  ;;  %v500_v9 = vrot.slane %v482_v61, 1  ;;  %v501_v12 = vrot.slane %v483_v62, 1  ;;  %v503_v13 = vrot.slane %v485_v0, 1  ;;  %v974_v61 = vld [vmem:[%s2051_s4 + $0x178] sm:$0xff] }
 0x16e   :  { %1465 = vmatpush3.bf16.msra.mxu1 %v1873_v5  ;;  %1255 = vmatprep.mubr.f32.mxu1 %v484_v63  ;;  %v495_v14 = vsel %vm95_vm0, %v491_v8, %v488_v7  ;;  %v494_v16 = vsel %vm95_vm0, %v488_v7, %v489_v4  ;;  %v1522_v62 = vpack.c.bf16 %v974_v61, %v973_v60 }
 0x16f   :  { %1467 = vmatprep.subr.bf16.mxu1 %v1466_v1  ;;  %v493_v17 = vsel %vm95_vm0, %v489_v4, %v490_v11  ;;  %v492_v18 = vsel %vm95_vm0, %v490_v11, %v491_v8  ;;  %v506_v19 = vsel %vm112_vm3, %v500_v9, %v501_v12  ;;  %v1912_v5 = vsel %vm112_vm3, %v501_v12, %v502_v6 }
 0x170   :  { %v1922_v22 = vsel %vm112_vm3, %v502_v6, %v503_v13  ;;  %v1926_v23 = vsel %vm112_vm3, %v503_v13, %v500_v9 }
 0x171   :  { %1256 = vmatmul.mubr.f32.gmra.mrb[2].mxu1 %v485_v0 }
 0x172   :  { %1469 = vmatpush3.bf16.msra.mxu1 %v1466_v1  ;;  %1290 = vmatprep.mubr.msk.f32.mxu1 %vm1690_vm1, %v495_v14 }
 0x173   :  { %1471 = vmatprep.subr.bf16.mxu1 %v1470_v15 }
 0x176   :  { %1473 = vmatpush3.bf16.msra.mxu1 %v1470_v15 }
 0x177   :  { %1475 = vmatprep.subr.bf16.mxu1 %v1474_v24 }
 0x17a   :  { %1477 = vmatpush3.bf16.msra.mxu1 %v1474_v24 }
 0x17b   :  { %1479 = vmatprep.subr.bf16.mxu1 %v1478_v29 }
 0x17e   :  { %1481 = vmatpush3.bf16.msra.mxu1 %v1478_v29 }
 0x17f   :  { %1483 = vmatprep.subr.bf16.mxu1 %v1482_v28 }
 0x182   :  { %1485 = vmatpush3.bf16.msra.mxu1 %v1482_v28 }
 0x183   :  { %1487 = vmatprep.subr.bf16.mxu1 %v1486_v33 }
 0x186   :  { %1489 = vmatpush3.bf16.msra.mxu1 %v1486_v33 }
 0x187   :  { %1491 = vmatprep.subr.bf16.mxu1 %v1490_v37 }
 0x18a   :  { %1493 = vmatpush3.bf16.msra.mxu1 %v1490_v37 }
 0x18b   :  { %1495 = vmatprep.subr.bf16.mxu1 %v1494_v41 }
 0x18d   :  { %1291 = vmatmul.mubr.f32.vlgmr.msra.gmra.mrb[0].mxu1 %v494_v16 }
 0x18e   :  { %1293 = vmatprep.mubr.msk.f32.mxu1 %vm1748_vm2, %v493_v17  ;;  %1497 = vmatpush3.bf16.msra.mxu1 %v1494_v41 }
 0x18f   :  { %1499 = vmatprep.subr.bf16.mxu1 %v1498_v45 }
 0x191   :  { %1294 = vmatmul.mubr.f32.gmra.mrb[2].mxu1 %v492_v18 }
 0x192   :  { %1501 = vmatpush3.bf16.msra.mxu1 %v1498_v45  ;;  %1328 = vmatprep.mubr.f32.mxu1 %v506_v19 }
 0x193   :  { %1503 = vmatprep.subr.bf16.mxu1 %v1502_v48 }
 0x196   :  { %1505 = vmatpush3.bf16.msra.mxu1 %v1502_v48 }
 0x197   :  { %1507 = vmatprep.subr.bf16.mxu1 %v1506_v51 }
 0x19a   :  { %1509 = vmatpush3.bf16.msra.mxu1 %v1506_v51 }
 0x19b   :  { %1511 = vmatprep.subr.bf16.mxu1 %v1510_v53 }
 0x19e   :  { %1513 = vmatpush3.bf16.msra.mxu1 %v1510_v53 }
 0x19f   :  { %1515 = vmatprep.subr.bf16.mxu1 %v1514_v56 }
 0x1a2   :  { %1517 = vmatpush3.bf16.msra.mxu1 %v1514_v56 }
 0x1a3   :  { %1519 = vmatprep.subr.bf16.mxu1 %v1518_v59 }
 0x1a6   :  { %1521 = vmatpush3.bf16.msra.mxu1 %v1518_v59 }
 0x1a7   :  { %1523 = vmatprep.subr.bf16.mxu1 %v1522_v62 }
 0x1aa   :  { %1525 = vmatpush3.bf16.msra.mxu1 %v1522_v62 }
 0x1ad   :  { %1329 = vmatmul.mubr.msk.f32.vlgmr.msra.gmra.mrb[0].mxu1 %vm1803_vm4, %v1912_v5 }
 0x1ae   :  { %1331 = vmatprep.mubr.f32.mxu1 %v1922_v22 }
 0x1b1   :  { %1332 = vmatmul.mubr.msk.f32.gmra.mrb[2].mxu1 %vm1813_vm5, %v1926_v23 }
 0x280   :  { %v1330_v63 = vpop.f32.mrb[0].mxu1 }
 0x281   :  { %v832_v0 = vmul.f32 %v1330_v63, %v1330_v63  ;;  %v798_v1 = vpop.f32.mrb[1].mxu1 }
 0x282   :  { %v821_v2 = vadd.f32 %v1330_v63, %v798_v1  ;;  %v831_v3 = vmul.f32 %v798_v1, %v798_v1 }
 0x284   :  { %v835_v4 = vadd.f32 %v832_v0, %v831_v3  ;;  %v1333_v6 = vpop.f32.mrb[2].mxu1 }
 0x285   :  { %v808_v7 = vpop.f32.mrb[3].mxu1  ;;  %v834_v9 = vmul.f32 %v1333_v6, %v1333_v6 }
 0x286   :  { %v822_v8 = vadd.f32 %v821_v2, %v808_v7  ;;  %v833_v11 = vmul.f32 %v808_v7, %v808_v7 }
 0x288   :  { %v823_v12 = vadd.f32 %v1333_v6, %v822_v8  ;;  %v836_v39 = vadd.f32 %v835_v4, %v833_v11 }
 0x28a   :  { %v824_v13 = vrot.slane %v823_v12, 4  ;;  %v837_v14 = vadd.f32 %v836_v39, %v834_v9 }
 0x28c   :  { %v825_v15 = vadd.f32 %v824_v13, %v823_v12  ;;  %v838_v16 = vrot.slane %v837_v14, 4 }
 0x28e   :  { %v826_v17 = vrot.slane %v825_v15, 2  ;;  %v839_v36 = vadd.f32 %v838_v16, %v837_v14 }
 0x290   :  { %v827_v18 = vadd.f32 %v826_v17, %v825_v15  ;;  %v840_v19 = vrot.slane %v839_v36, 2 }
 0x292   :  { %v828_v5 = vrot.slane %v827_v18, 1  ;;  %v841_v20 = vadd.f32 %v840_v19, %v839_v36 }
 0x294   :  { %v829_v21 = vadd.f32 %v828_v5, %v827_v18  ;;  %v842_v22 = vrot.slane %v841_v20, 1 }
 0x296   :  { %v830_v23 = vmul.f32 0.03125, %v829_v21  ;;  %v843_v24 = vadd.f32 %v842_v22, %v841_v20 }
 0x298   :  { %v844_v25 = vmul.f32 0.03125, %v843_v24  ;;  %v845_v26 = vmul.f32 %v830_v23, %v830_v23 }
 0x29a   :  { %v846_v29 = vsub.f32 %v844_v25, %v845_v26 }
 0x29c   :  { %v847_v27 = vadd.f32 1e-05, %v846_v29 }
 0x29e   :  { %1544 = vrsqrt.f32 %v847_v27 }
 0x2a8   :  { %v1545_v28 = vpop.eup %1544 }
 0x2a9   :  { %v849_v30 = vmul.f32 %v1545_v28, %v486_v43 }
 0x2ab   :  { %v850_v33 = vmul.f32 %v849_v30, %v830_v23  ;;  %v856_v34 = vrot.slane %v849_v30, %v1880_v42 }
 0x2ad   :  { %v851_v35 = vsub.f32 %v487_v31, %v850_v33  ;;  %v858_v37 = vmul.f32 %v856_v34, %v798_v1  ;;  %v859_v38 = vmul.f32 %v1330_v63, %v856_v34  ;;  %v860_v40 = vmul.f32 %v856_v34, %v808_v7 }
 0x2ae   :  { %v861_v41 = vmul.f32 %v1333_v6, %v856_v34 }
 0x2af   :  { %v866_v32 = vrot.slane %v851_v35, %v1880_v42 }
 0x2b1   :  { %v868_v44 = vadd.f32 %v866_v32, %v858_v37  ;;  %v869_v45 = vadd.f32 %v866_v32, %v859_v38  ;;  %v870_v46 = vadd.f32 %v866_v32, %v860_v40  ;;  %v871_v47 = vadd.f32 %v866_v32, %v861_v41 }
 0x2b3   :  { %v872_v48 = vmax.f32 %v868_v44, 0.0  ;;  %v873_v49 = vmax.f32 %v869_v45, 0.0  ;;  %v874_v50 = vmax.f32 %v870_v46, 0.0  ;;  %v875_v51 = vmax.f32 %v871_v47, 0.0 }
 0x2b5   :  { %876 = vst [vmem:[%s2056_s7] sm:$0xff] %v872_v48  ;;  %877 = vst [vmem:[%s2056_s7 + $0x8] sm:$0xff] %v873_v49 }
 0x2b6   :  { %878 = vst [vmem:[%s2056_s7 + $0x10] sm:$0xff] %v874_v50  ;;  %879 = vst [vmem:[%s2056_s7 + $0x18] sm:$0xff] %v875_v51 }
 0x2bc   :  { %v880_v42 = vld [vmem:[%s2056_s7] ss:$2 sm:$0xff]  ;;  %v980_v52 = vld [vmem:[%s2056_s7 + $0x1] ss:$2 sm:$0xff] }
 0x2bd   :  { %v979_v10 = vld [vmem:[%s2056_s7 + $0x10] ss:$2 sm:$0xff]  ;;  %v981_v53 = vld [vmem:[%s2056_s7 + $0x11] ss:$2 sm:$0xff]  ;;  %v887_v54 = vmax.f32 %v880_v42, %v980_v52 }
 0x2be   :  { %v888_v55 = vmax.f32 %v979_v10, %v981_v53 }
 0x2bf   :  { %889 = vst [vmem:[%s2057_s8] sm:$0xff] %v887_v54 }
 0x2c0   :  { %890 = vst [vmem:[%s2057_s8 + $0x8] sm:$0xff] %v888_v55 }

</bundles_post_ra>
